<compile_context>
chip_gen: v7x
topology: tpu7x:2x2x1
jax: 0.10.0
libtpu: 0.0.40
codegen_flags: <defaults>
</compile_context>

<pallas_src>
import math

import jax
import jax.numpy as jnp
from jax.experimental import pallas as pl
from jax.experimental.pallas import tpu as pltpu


# ----------------------------------------------------------------------------
# Constant buffer (mirrors torch __init__)
# ----------------------------------------------------------------------------
def make_positional_table(max_len: int, d_model: int) -> jnp.ndarray:
    """pe of shape (max_len, d_model), float32 (torch's unit batch dim is
    re-added by broadcasting in the wrapper/kernel)."""
    position = jnp.arange(max_len, dtype=jnp.float32)[:, None]
    div_term = jnp.exp(
        jnp.arange(0, d_model, 2, dtype=jnp.float32) * (-math.log(10000.0) / d_model)
    )
    pe = jnp.zeros((max_len, d_model), dtype=jnp.float32)
    pe = pe.at[:, 0::2].set(jnp.sin(position * div_term))
    pe = pe.at[:, 1::2].set(jnp.cos(position * div_term))
    return pe


# ----------------------------------------------------------------------------
# Hardware / tiling helpers
# ----------------------------------------------------------------------------
def _vmem_capacity_bytes() -> int:
    """Physical VMEM per TensorCore, with a conservative (v7x) fallback."""
    try:
        cap = getattr(pltpu.get_tpu_info(), "vmem_capacity_bytes", None)
        if cap:
            return int(cap)
    except Exception:
        pass
    return 64 << 20


def _two_tensorcores_per_chip() -> bool:
    """True on 2-TensorCore chips (v7x): gates CORE_PARALLEL."""
    try:
        kind = jax.devices()[0].device_kind.lower()
        return ("v7" in kind) or ("tpu7" in kind)
    except Exception:
        return False


def _tile_candidates(n: int, quantum: int) -> list[int]:
    """Divisors of n that are multiples of `quantum`, plus n itself (desc)."""
    cands = {n}
    for c in range(quantum, n, quantum):
        if n % c == 0:
            cands.add(c)
    return sorted(cands, reverse=True)


def _pick_rows_tiles(S, B, D, itemsize, target_bytes):
    s_cands = _tile_candidates(S, 8)        # ts_pe: multiple of 8 dividing S, or S
    d_cands = _tile_candidates(D, 128)      # td:    multiple of 128 dividing D, or D
    for td in d_cands:                      # prefer full-D (lane-dense) tiles
        for ts in s_cands:                  # then the biggest S tile that fits
            if ts * B * td * itemsize <= target_bytes:
                return ts, td
    return s_cands[-1], d_cands[-1]         # nothing fits: smallest legal block


def _pick_lanes_tile(S, lane_w, itemsize, target_bytes):
    s_cands = _tile_candidates(S, 8)
    for ts in s_cands:
        if ts * lane_w * itemsize <= target_bytes:
            return ts
    return s_cands[-1]


# ----------------------------------------------------------------------------
# Kernel factory
# ----------------------------------------------------------------------------
def _make_kernel(*, batch, mode, p, train, with_seed, grid_rank):
    inv_keep = 0.0 if p >= 1.0 else 1.0 / (1.0 - p)

    def compute(x_ref, pe_ref, o_ref, seed_ref):
        x = x_ref[...]                      # rows: (ts*B, td) | lanes: (ts, B*D)
        pe_t = pe_ref[...]                  # rows: (ts,   td) | lanes: (ts, D)

        if batch == 1:
            pe_b = pe_t
        elif mode == "rows":
            # Replicate each pe row `batch` times along sublanes (per-tile,
            # in-register; hidden under the HBM-bound stream).
            ts, td = pe_t.shape
            pe_b = jnp.broadcast_to(pe_t[:, None, :], (ts, batch, td))
            pe_b = pe_b.reshape(ts * batch, td)
        else:                               # "lanes": b-major flatten of (B, D)
            pe_b = jnp.concatenate([pe_t] * batch, axis=-1)

        y = x + pe_b

        if train and p > 0.0:
            if p >= 1.0:
                y = jnp.zeros_like(y)
            else:
                pid = pl.program_id(0)
                for ax in range(1, grid_rank):
                    pid = pid * pl.num_programs(ax) + pl.program_id(ax)
                # TODO(synk): mask depends on tiling / grid position, so it
                # cannot bit-match torch's RNG stream (eval mode is exact).
                pltpu.prng_seed(seed_ref[0] ^ (pid * jnp.int32(668265261)))
                keep = pltpu.stateful_bernoulli(p=1.0 - p, shape=y.shape)
                y = jnp.where(keep.astype(jnp.bool_), y * inv_keep,
                              jnp.zeros_like(y))

        o_ref[...] = y.astype(o_ref.dtype)

    if with_seed:
        def kernel(seed_ref, x_ref, pe_ref, o_ref):
            compute(x_ref, pe_ref, o_ref, seed_ref)
    else:
        def kernel(x_ref, pe_ref, o_ref):
            compute(x_ref, pe_ref, o_ref, None)
    return kernel


# ----------------------------------------------------------------------------
# Wrapper
# ----------------------------------------------------------------------------
def positional_encoding(
    x: jnp.ndarray,          # (S, B, D)
    pe: jnp.ndarray,         # (max_len, D)
    *,
    p: float = 0.1,
    train: bool = False,
    seed: int = 0,
    target_block_bytes: int | None = None,
    core_parallel: bool | None = None,
) -> jnp.ndarray:
    S, B, D = x.shape
    assert S <= pe.shape[0] and D == pe.shape[1]
    dtype = x.dtype
    itemsize = jnp.dtype(dtype).itemsize

    # pe slice + single cast in plain JAX; the kernel adds in x.dtype.
    pe2 = pe[:S].astype(dtype)                              # (S, D)

    # ----- layout choice (the big lever: keep sublanes AND lanes dense) -----
    if D % 128 == 0 or (B * D) % 128 != 0:
        mode = "rows"        # x -> (S*B, D); lane-dense iff D % 128 == 0
    else:
        mode = "lanes"       # x -> (S, B*D); lane-dense since (B*D) % 128 == 0
    # TODO(synk): shapes where S has no multiple-of-8 divisor and D % 128 != 0
    # fall back to a single full block; padding S/D in the wrapper would be
    # required to tile those efficiently.

    vmem_cap = _vmem_capacity_bytes()
    if target_block_bytes is None:
        # Biggest block whose double-buffered working set (2 in + 2 out + pe)
        # stays well under physical VMEM; >=512-wide tiles reach ~85% HBM BW.
        target_block_bytes = max(1 << 20, min(8 << 20, int(0.4 * vmem_cap) // 5))

    if mode == "rows":
        rows = S * B
        x2 = x.reshape(rows, D)                              # free view
        ts_pe, td = _pick_rows_tiles(S, B, D, itemsize, target_block_bytes)
        tile_rows = ts_pe * B
        grid = (S // ts_pe, D // td)
        x_spec = pl.BlockSpec((tile_rows, td), lambda i, j, *_: (i, j))
        pe_spec = pl.BlockSpec((ts_pe, td), lambda i, j, *_: (i, j))
        o_spec = pl.BlockSpec((tile_rows, td), lambda i, j, *_: (i, j))
        out2_shape = (rows, D)
        blk_x = tile_rows * td * itemsize
        blk_pe = ts_pe * td * itemsize
    else:
        lane_w = B * D
        x2 = x.reshape(S, lane_w)                            # free view
        tile_s = _pick_lanes_tile(S, lane_w, itemsize, target_block_bytes)
        grid = (S // tile_s,)
        x_spec = pl.BlockSpec((tile_s, lane_w), lambda i, *_: (i, 0))
        pe_spec = pl.BlockSpec((tile_s, D), lambda i, *_: (i, 0))
        o_spec = pl.BlockSpec((tile_s, lane_w), lambda i, *_: (i, 0))
        out2_shape = (S, lane_w)
        blk_x = tile_s * lane_w * itemsize
        blk_pe = tile_s * D * itemsize

    # Megacore: only CORE_PARALLEL actually changes codegen; enable it on the
    # leading (largest) grid axis when the chip has 2 TensorCores (v7x).
    if core_parallel is None:
        core_parallel = _two_tensorcores_per_chip()
    if core_parallel:
        dim_sem = (pltpu.CORE_PARALLEL,) + (pltpu.PARALLEL,) * (len(grid) - 1)
    else:
        dim_sem = ("parallel",) * len(grid)

    # VMEM budget: 2x double-buffered x-in + 2x out + 2x pe + 25% + 2 MiB,
    # capped at 75% of physical VMEM (<= 48 MiB on v7x).
    vmem_limit = int(1.25 * (4 * blk_x + 2 * blk_pe)) + (2 << 20)
    vmem_limit = max(4 << 20, min(vmem_limit, int(0.75 * vmem_cap)))

    cparams = pltpu.CompilerParams(
        dimension_semantics=dim_sem,
        vmem_limit_bytes=vmem_limit,
    )
    cost = pl.CostEstimate(
        flops=x.size,
        transcendentals=0,
        bytes_accessed=2 * x.size * itemsize + pe2.size * itemsize,
    )

    use_dropout = bool(train) and p > 0.0
    kernel = _make_kernel(batch=B, mode=mode, p=float(p), train=bool(train),
                          with_seed=use_dropout, grid_rank=len(grid))
    out_sds = jax.ShapeDtypeStruct(out2_shape, dtype)

    if use_dropout:
        seed_arr = jnp.array([seed], dtype=jnp.int32)
        # No output aliasing here: with a scalar-prefetch operand in front the
        # alias index is ambiguous, and train mode is not the hot path.
        out2 = pl.pallas_call(
            kernel,
            out_shape=out_sds,
            grid_spec=pltpu.PrefetchScalarGridSpec(
                num_scalar_prefetch=1,            # dropout seed lives in SMEM
                grid=grid,
                in_specs=[x_spec, pe_spec],
                out_specs=o_spec,
            ),
            compiler_params=cparams,
            cost_estimate=cost,
        )(seed_arr, x2, pe2)
    else:
        out2 = pl.pallas_call(
            kernel,
            out_shape=out_sds,
            grid=grid,
            in_specs=[x_spec, pe_spec],
            out_specs=o_spec,
            compiler_params=cparams,
            cost_estimate=cost,
            # out aliases x (semantically in-place); this only skips the extra
            # HBM pass if the caller donates x (jit donate_argnums).
            input_output_aliases={0: 0},
        )(x2, pe2)

    return out2.reshape(S, B, D)


# ----------------------------------------------------------------------------
# Demo / correctness checks (eval mode, dropout == identity)
# ----------------------------------------------------------------------------
if __name__ == "__main__":
    MAX_LEN = 64
    P_DROP = 0.1
    root = jax.random.PRNGKey(0)

    def run_case(S, B, D, **kw):
        pe = make_positional_table(MAX_LEN, D)
        key = jax.random.fold_in(root, S * 100003 + B * 1009 + D)
        x = jax.random.normal(key, (S, B, D), dtype=jnp.float32)
        ref = x + pe[:S][:, None, :]
        out = jax.block_until_ready(
            positional_encoding(x, pe, p=P_DROP, train=False, **kw))
        assert out.shape == x.shape and out.dtype == x.dtype
        assert jnp.allclose(out, ref, atol=1e-6, rtol=1e-6), (S, B, D)

    # d_model % 128 == 0 -> collapsed-rows layout (dense sublanes AND lanes)
    run_case(32, 2, 256)
    # same shape, tiny tile target -> exercises a real (4, 2) grid / pipeline
    run_case(32, 2, 256, target_block_bytes=8 * 1024)
    # d_model < 128 but B*D % 128 == 0 -> (S, B*D) lane-flattened layout
    run_case(8, 4, 32)
    # neither divisible -> rows fallback (dense sublanes, masked lanes)
    run_case(8, 2, 32)

    print("KERNEL_OK")
</pallas_src>

<mosaic_0001>
module attributes {stable_mosaic.version = 11 : i64} {
  func.func @kernel(%arg0: i32, %arg1: i32, %arg2: memref<64x256xf32, #tpu.memory_space<vmem>>, %arg3: memref<32x256xf32, #tpu.memory_space<vmem>>, %arg4: memref<64x256xf32, #tpu.memory_space<vmem>>) attributes {dimension_semantics = [#tpu.dimension_semantics<parallel>, #tpu.dimension_semantics<parallel>], iteration_bounds = array<i64: 1, 1>, scalar_prefetch = 0 : i64, scratch_operands = 0 : i64, tpu.core_type = #tpu.core_type<tc>, window_params = [{transform_indices = @transform_0, window_bounds = array<i64: 64, 256>}, {transform_indices = @transform_1, window_bounds = array<i64: 32, 256>}, {transform_indices = @transform_2, window_bounds = array<i64: 64, 256>}]} {
    %c0 = arith.constant 0 : index
    %c0_0 = arith.constant 0 : index
    %0 = vector.load %arg2[%c0, %c0_0] : memref<64x256xf32, #tpu.memory_space<vmem>>, vector<64x256xf32>
    %c0_1 = arith.constant 0 : index
    %c0_2 = arith.constant 0 : index
    %1 = vector.load %arg3[%c0_1, %c0_2] : memref<32x256xf32, #tpu.memory_space<vmem>>, vector<32x256xf32>
    %2 = vector.shape_cast %1 : vector<32x256xf32> to vector<32x1x256xf32>
    %3 = vector.shape_cast %2 : vector<32x1x256xf32> to vector<32x1x256xf32>
    %4 = vector.broadcast %3 : vector<32x1x256xf32> to vector<32x2x256xf32>
    %5 = vector.shape_cast %4 : vector<32x2x256xf32> to vector<64x256xf32>
    %6 = arith.addf %0, %5 : vector<64x256xf32>
    %c0_3 = arith.constant 0 : index
    %c0_4 = arith.constant 0 : index
    %7 = vector.load %arg4[%c0_3, %c0_4] : memref<64x256xf32, #tpu.memory_space<vmem>>, vector<64x256xf32>
    tpu.vector_store %arg4[%c0_3, %c0_4], %6 {strides = array<i32>} : memref<64x256xf32, #tpu.memory_space<vmem>>, vector<64x256xf32>,
    return
  }
  func.func @transform_0(%arg0: i32, %arg1: i32) -> (i32, i32) {
    %c0_i32 = arith.constant 0 : i32
    return %arg0, %arg1 : i32, i32
  }
  func.func @transform_1(%arg0: i32, %arg1: i32) -> (i32, i32) {
    %c0_i32 = arith.constant 0 : i32
    return %arg0, %arg1 : i32, i32
  }
  func.func @transform_2(%arg0: i32, %arg1: i32) -> (i32, i32) {
    %c0_i32 = arith.constant 0 : i32
    return %arg0, %arg1 : i32, i32
  }
}

</mosaic_0001>

<bundles_post_ra>
// kernel: tpu_custom_call.1
= control target key start
LH: loop header
LB: loop body
LE: loop exit
PB: predicated region body
PF: predicated region fallthrough
CT: control target
= control target key end

     0   :  { %7 = vsyncpa [#allocation3], 0  ;;  %s1274_s0 = inlined_call_operand.hbm [shape: f32[64,256], index: 0, kind: input, shape index: {}, may-alias: {0,2}]   ;;  %s1275_s1 = inlined_call_operand.vmem [shape: f32[32,256], index: 1, kind: input, shape index: {}]   ;;  %s1276_s2 = inlined_call_operand.hbm [shape: f32[64,256], index: 2, kind: output, shape index: {}, may-alias: {0,2}]  }
   0x1   :  { %8 = vsyncpa [#allocation4], 0  ;;  %s1045_s9 = smov [#allocation2]   ;;  %s997_s13 = scalar_lea.hbm %s1274_s0, 2048 }
   0x2   :  { %s14_s10 = sshll.u32 %s1045_s9, 4  ;;  %p998_p0 = scmp.ne.s32.totalorder %s1274_s0, %s997_s13  ;;  %s15_s10 = int_to_ptr.vmem [resolvable:$true] %s14_s10 }
   0x3   :  { %p1001_p1 = scmp.lt.u32.totalorder %s997_s13, %s1274_s0 }
   0x5   :  { %p1003_p2 = pnand %p1001_p1, %p998_p0 }
   0x7   :  { %1006 = shalt.err (!%p1003_p2)
}
   0x8   :  { %s1007_s18 = scalar_lea.vmem %s15_s10, 2048  ;;  %p1012_p4 = scmp.lt.s32.totalorder %s15_s10, %s15_s10 }
   0x9   :  { %p1008_p3 = scmp.ne.s32.totalorder %s15_s10, %s1007_s18  ;;  %p1013_p5 = scmp.lt.s32.totalorder %s1007_s18, %s1007_s18 }
   0xb   :  { %p1014_p6 = por %p1013_p5, %p1012_p4 }
   0xd   :  { %p1015_p7 = pnand %p1014_p6, %p1008_p3 }
   0xf   :  { %1018 = shalt.err (!%p1015_p7)
}
  0x10   :  { %s1046_s19 = smov 256   ;;  %s1047_s20 = smov 16  }
  0x11   :  { %20 = dma.hbm_to_vmem [thread:$0]  %s1274_s0, 2048, %s15_s10, [#allocation3], %s1046_s19, %s1046_s19, %s1047_s20  }
  0x12   :  { %1041 = dma.done.wait [#allocation3], 2048  }
  0x13   :  { %1042 = vsyncadd [#allocation3], 4294965248  ;;  %v63_v0 = vlaneseq  ;;  %v1048_v1 = vmov 1966171168   ;;  %v1049_v5 = vmov 1983009808  }
  0x14   :  { %v61_v2 = vunpack.c.l.s4 %v1048_v1  ;;  %v516_v6 = vunpack.c.l.s4 %v1049_v5  ;;  %v985_v8 = vld [vmem:[%s1275_s1] ss:$8 sps:$4 sm:$0xff]   ;;  %v987_v10 = vld [vmem:[%s1275_s1 + $0x4] ss:$8 sps:$4 sm:$0xff]   ;;  %v988_v14 = vld [vmem:[%s1275_s1 + $0x10] ss:$8 sps:$4 sm:$0xff]  }
  0x15   :  { %v64_v3 = vshrl.u32 %v63_v0, 7  ;;  %v990_v16 = vld [vmem:[%s1275_s1 + $0x14] ss:$8 sps:$4 sm:$0xff]  }
  0x16   :  { %v62_v4 = vunpack.c.0.s8 %v61_v2  ;;  %v517_v9 = vunpack.c.0.s8 %v516_v6 }
  0x17   :  { %v1090_v12 = vsub.s32 0, %v64_v3  ;;  %v1092_v13 = vsub.s32 1, %v64_v3 }
  0x18   :  { %v1081_v7 = vsub.s32 %v62_v4, %v64_v3  ;;  %v1102_v19 = vsub.s32 %v517_v9, %v64_v3 }
  0x1a   :  { %v66_v11 = vrot.slane %v985_v8, %v1081_v7  ;;  %v73_v15 = vrot.slane %v987_v10, %v1081_v7  ;;  %v116_v22 = vrot.slane %v988_v14, %v1081_v7  ;;  %v1107_v23 = vrot.slane %v990_v16, %v1081_v7  ;;  %v27_v16 = vld [vmem:[#allocation2 + $0x8] sm:$0xff] }
  0x1c   :  { %v74_v17 = vcombine.high %v66_v11, %v66_v11  ;;  %v82_v18 = vrot.slane %v66_v11, %v1081_v7  ;;  %v75_v20 = vcombine.high %v73_v15, %v73_v15  ;;  %v89_v21 = vrot.slane %v73_v15, %v1081_v7  ;;  %v26_v15 = vld [vmem:[#allocation2] sm:$0xff] }
  0x1d   :  { %v124_v59 = vcombine.high %v116_v22, %v116_v22  ;;  %v132_v63 = vrot.slane %v116_v22, %v1081_v7 }
  0x1e   :  { %v96_v24 = vrot.slane %v74_v17, %v1081_v7  ;;  %v104_v25 = vcombine.high %v82_v18, %v82_v18  ;;  %v261_v26 = vrot.slane %v82_v18, %v1090_v12  ;;  %v265_v27 = vrot.slane %v82_v18, %v1092_v13 }
  0x1f   :  { %v103_v28 = vrot.slane %v75_v20, %v1081_v7  ;;  %v105_v29 = vcombine.high %v89_v21, %v89_v21  ;;  %v293_v30 = vrot.slane %v89_v21, %v1090_v12  ;;  %v297_v31 = vrot.slane %v89_v21, %v1092_v13 }
  0x20   :  { %v106_v32 = vcombine.high %v96_v24, %v96_v24  ;;  %v269_v33 = vrot.slane %v96_v24, %v1090_v12  ;;  %v273_v34 = vrot.slane %v96_v24, %v1092_v13  ;;  %v277_v35 = vrot.slane %v104_v25, %v1090_v12 }
  0x21   :  { %v281_v36 = vrot.slane %v104_v25, %v1092_v13  ;;  %v514_v37 = vcombine.low %v261_v26, %v265_v27  ;;  %v107_v38 = vcombine.high %v103_v28, %v103_v28  ;;  %v301_v39 = vrot.slane %v103_v28, %v1090_v12  ;;  %v28_v25 = vld [vmem:[#allocation2 + $0x10] sm:$0xff] }
  0x22   :  { %v285_v40 = vrot.slane %v106_v32, %v1090_v12  ;;  %v289_v41 = vrot.slane %v106_v32, %v1092_v13  ;;  %v522_v42 = vcombine.low %v269_v33, %v273_v34  ;;  %v305_v43 = vrot.slane %v103_v28, %v1092_v13  ;;  %v29_v28 = vld [vmem:[#allocation2 + $0x18] sm:$0xff]  ;;  %v991_v33 = vld [vmem:[%s1275_s1 + $0x20] ss:$8 sps:$4 sm:$0xff]   ;;  %v993_v34 = vld [vmem:[%s1275_s1 + $0x24] ss:$8 sps:$4 sm:$0xff]  }
  0x23   :  { %v521_v44 = vrot.slane %v514_v37, %v1102_v19  ;;  %v530_v45 = vcombine.low %v277_v35, %v281_v36  ;;  %v309_v46 = vrot.slane %v105_v29, %v1090_v12  ;;  %v313_v47 = vrot.slane %v105_v29, %v1092_v13 }
  0x24   :  { %v529_v48 = vrot.slane %v522_v42, %v1102_v19  ;;  %v538_v49 = vcombine.low %v285_v40, %v289_v41  ;;  %v317_v50 = vrot.slane %v107_v38, %v1090_v12  ;;  %v321_v51 = vrot.slane %v107_v38, %v1092_v13 }
  0x25   :  { %v537_v52 = vrot.slane %v530_v45, %v1102_v19  ;;  %v546_v53 = vcombine.low %v293_v30, %v297_v31  ;;  %v554_v54 = vcombine.low %v301_v39, %v305_v43  ;;  %v562_v55 = vcombine.low %v309_v46, %v313_v47 }
  0x26   :  { %v545_v56 = vrot.slane %v538_v49, %v1102_v19  ;;  %v770_v57 = vcombine.low %v521_v44, %v529_v48  ;;  %v570_v58 = vcombine.low %v317_v50, %v321_v51  ;;  %v146_v3 = vrot.slane %v124_v59, %v1081_v7 }
  0x27   :  { %v553_v60 = vrot.slane %v546_v53, %v1102_v19  ;;  %v561_v61 = vrot.slane %v554_v54, %v1102_v19  ;;  %v569_v62 = vrot.slane %v562_v55, %v1102_v19  ;;  %v154_v5 = vcombine.high %v132_v63, %v132_v63 }
  0x28   :  { %v771_v0 = vcombine.low %v537_v52, %v545_v56  ;;  %v778_v1 = vrot.slane %v770_v57, %v1102_v19  ;;  %v577_v2 = vrot.slane %v570_v58, %v1102_v19  ;;  %v325_v6 = vrot.slane %v132_v63, %v1090_v12 }
  0x29   :  { %v788_v4 = vcombine.low %v553_v60, %v561_v61  ;;  %v329_v8 = vrot.slane %v132_v63, %v1092_v13  ;;  %v156_v11 = vcombine.high %v146_v3, %v146_v3  ;;  %v333_v14 = vrot.slane %v146_v3, %v1090_v12 }
  0x2a   :  { %v785_v9 = vrot.slane %v771_v0, %v1102_v19  ;;  %v789_v10 = vcombine.low %v569_v62, %v577_v2  ;;  %v337_v18 = vrot.slane %v146_v3, %v1092_v13  ;;  %v341_v20 = vrot.slane %v154_v5, %v1090_v12  ;;  %v30_v2 = vld [vmem:[#allocation2 + $0x20] sm:$0xff]  ;;  %v31_v3 = vld [vmem:[#allocation2 + $0x28] sm:$0xff] }
  0x2b   :  { %v796_v17 = vrot.slane %v788_v4, %v1102_v19  ;;  %v345_v21 = vrot.slane %v154_v5, %v1092_v13  ;;  %v349_v27 = vrot.slane %v156_v11, %v1090_v12  ;;  %v353_v29 = vrot.slane %v156_v11, %v1092_v13 }
  0x2c   :  { %v786_v22 = vcombine.low %v778_v1, %v785_v9  ;;  %v787_v24 = vcombine.high %v778_v1, %v785_v9  ;;  %v803_v26 = vrot.slane %v789_v10, %v1102_v19  ;;  %v578_v30 = vcombine.low %v325_v6, %v329_v8 }
  0x2d   :  { %v586_v31 = vcombine.low %v333_v14, %v337_v18  ;;  %v594_v32 = vcombine.low %v341_v20, %v345_v21  ;;  %v602_v42 = vcombine.low %v349_v27, %v353_v29  ;;  %v125_v45 = vcombine.high %v1107_v23, %v1107_v23  ;;  %v994_v29 = vld [vmem:[%s1275_s1 + $0x30] ss:$8 sps:$4 sm:$0xff]  }
  0x2e   :  { %v930_v35 = vadd.f32 %v786_v22, %v26_v15  ;;  %v931_v36 = vadd.f32 %v787_v24, %v27_v16  ;;  %v804_v37 = vcombine.low %v796_v17, %v803_v26  ;;  %v805_v38 = vcombine.high %v796_v17, %v803_v26 }
  0x2f   :  { %v585_v39 = vrot.slane %v578_v30, %v1102_v19  ;;  %v593_v40 = vrot.slane %v586_v31, %v1102_v19  ;;  %v601_v41 = vrot.slane %v594_v32, %v1102_v19  ;;  %v139_v46 = vrot.slane %v1107_v23, %v1081_v7 }
  0x30   :  { %946 = vst [vmem:[#allocation5] sm:$0xff] %v930_v35  ;;  %947 = vst [vmem:[#allocation5 + $0x8] sm:$0xff] %v931_v36  ;;  %v932_v43 = vadd.f32 %v804_v37, %v28_v25  ;;  %v933_v44 = vadd.f32 %v805_v38, %v29_v28  ;;  %v609_v47 = vrot.slane %v602_v42, %v1102_v19 }
  0x31   :  { %v806_v48 = vcombine.low %v585_v39, %v593_v40  ;;  %v166_v49 = vrot.slane %v991_v33, %v1081_v7  ;;  %v1165_v50 = vrot.slane %v993_v34, %v1081_v7  ;;  %v153_v51 = vrot.slane %v125_v45, %v1081_v7 }
  0x32   :  { %948 = vst [vmem:[#allocation5 + $0x10] sm:$0xff] %v932_v43  ;;  %949 = vst [vmem:[#allocation5 + $0x18] sm:$0xff] %v933_v44  ;;  %v155_v52 = vcombine.high %v139_v46, %v139_v46  ;;  %v357_v53 = vrot.slane %v139_v46, %v1090_v12  ;;  %v361_v54 = vrot.slane %v139_v46, %v1092_v13  ;;  %v32_v46 = vld [vmem:[#allocation2 + $0x30] sm:$0xff] }
  0x33   :  { %v807_v55 = vcombine.low %v601_v41, %v609_v47  ;;  %v814_v23 = vrot.slane %v806_v48, %v1102_v19  ;;  %v174_v56 = vcombine.high %v166_v49, %v166_v49  ;;  %v182_v57 = vrot.slane %v166_v49, %v1081_v7  ;;  %v33_v47 = vld [vmem:[#allocation2 + $0x38] sm:$0xff] }
  0x34   :  { %v157_v58 = vcombine.high %v153_v51, %v153_v51  ;;  %v365_v59 = vrot.slane %v153_v51, %v1090_v12  ;;  %v369_v60 = vrot.slane %v153_v51, %v1092_v13  ;;  %v373_v61 = vrot.slane %v155_v52, %v1090_v12 }
  0x35   :  { %v821_v62 = vrot.slane %v807_v55, %v1102_v19  ;;  %v377_v63 = vrot.slane %v155_v52, %v1092_v13  ;;  %v610_v0 = vcombine.low %v357_v53, %v361_v54  ;;  %v196_v1 = vrot.slane %v174_v56, %v1081_v7 }
  0x36   :  { %v381_v4 = vrot.slane %v157_v58, %v1090_v12  ;;  %v385_v5 = vrot.slane %v157_v58, %v1092_v13  ;;  %v618_v6 = vcombine.low %v365_v59, %v369_v60  ;;  %v204_v8 = vcombine.high %v182_v57, %v182_v57 }
  0x37   :  { %v822_v9 = vcombine.low %v814_v23, %v821_v62  ;;  %v823_v10 = vcombine.high %v814_v23, %v821_v62  ;;  %v617_v11 = vrot.slane %v610_v0, %v1102_v19  ;;  %v626_v14 = vcombine.low %v373_v61, %v377_v63 }
  0x38   :  { %v625_v15 = vrot.slane %v618_v6, %v1102_v19  ;;  %v634_v16 = vcombine.low %v381_v4, %v385_v5  ;;  %v206_v17 = vcombine.high %v196_v1, %v196_v1  ;;  %v389_v18 = vrot.slane %v182_v57, %v1090_v12  ;;  %v35_v4 = vld [vmem:[#allocation2 + $0x48] sm:$0xff] }
  0x39   :  { %v934_v20 = vadd.f32 %v822_v9, %v30_v2  ;;  %v935_v21 = vadd.f32 %v823_v10, %v31_v3  ;;  %v633_v22 = vrot.slane %v626_v14, %v1102_v19  ;;  %v393_v24 = vrot.slane %v182_v57, %v1092_v13  ;;  %v34_v3 = vld [vmem:[#allocation2 + $0x40] sm:$0xff] }
  0x3a   :  { %v641_v25 = vrot.slane %v634_v16, %v1102_v19  ;;  %v824_v26 = vcombine.low %v617_v11, %v625_v15  ;;  %v397_v27 = vrot.slane %v196_v1, %v1090_v12  ;;  %v401_v28 = vrot.slane %v196_v1, %v1092_v13 }
  0x3b   :  { %950 = vst [vmem:[#allocation5 + $0x20] sm:$0xff] %v934_v20  ;;  %951 = vst [vmem:[#allocation5 + $0x28] sm:$0xff] %v935_v21  ;;  %v405_v30 = vrot.slane %v204_v8, %v1090_v12  ;;  %v409_v31 = vrot.slane %v204_v8, %v1092_v13  ;;  %v413_v32 = vrot.slane %v206_v17, %v1090_v12 }
  0x3c   :  { %v417_v33 = vrot.slane %v206_v17, %v1092_v13  ;;  %v825_v34 = vcombine.low %v633_v22, %v641_v25  ;;  %v832_v35 = vrot.slane %v824_v26, %v1102_v19  ;;  %v642_v36 = vcombine.low %v389_v18, %v393_v24  ;;  %v996_v26 = vld [vmem:[%s1275_s1 + $0x34] ss:$8 sps:$4 sm:$0xff]   ;;  %s1050_s1 = smov [#allocation5]  }
  0x3d   :  { %v650_v37 = vcombine.low %v397_v27, %v401_v28  ;;  %v658_v38 = vcombine.low %v405_v30, %v409_v31  ;;  %v175_v40 = vcombine.high %v1165_v50, %v1165_v50  ;;  %v189_v41 = vrot.slane %v1165_v50, %v1081_v7  ;;  %s967_s10 = sshll.u32 %s1050_s1, 4  ;;  %s968_s10 = int_to_ptr.vmem [resolvable:$true] %s967_s10 }
  0x3e   :  { %v666_v39 = vcombine.low %v413_v32, %v417_v33  ;;  %v839_v42 = vrot.slane %v825_v34, %v1102_v19  ;;  %v649_v43 = vrot.slane %v642_v36, %v1102_v19  ;;  %v216_v45 = vrot.slane %v994_v29, %v1081_v7  ;;  %s1019_s11 = scalar_lea.vmem %s968_s10, 2048  ;;  %p1024_p9 = scmp.lt.s32.totalorder %s968_s10, %s968_s10 }
  0x3f   :  { %v657_v44 = vrot.slane %v650_v37, %v1102_v19  ;;  %v665_v48 = vrot.slane %v658_v38, %v1102_v19  ;;  %v203_v51 = vrot.slane %v175_v40, %v1081_v7  ;;  %v205_v52 = vcombine.high %v189_v41, %v189_v41  ;;  %p1020_p8 = scmp.ne.s32.totalorder %s968_s10, %s1019_s11  ;;  %p1025_p10 = scmp.lt.s32.totalorder %s1019_s11, %s1019_s11 }
  0x40   :  { %v673_v49 = vrot.slane %v666_v39, %v1102_v19  ;;  %v840_v53 = vcombine.low %v832_v35, %v839_v42  ;;  %v841_v54 = vcombine.high %v832_v35, %v839_v42  ;;  %v421_v55 = vrot.slane %v189_v41, %v1090_v12 }
  0x41   :  { %v842_v50 = vcombine.low %v649_v43, %v657_v44  ;;  %v207_v56 = vcombine.high %v203_v51, %v203_v51  ;;  %v425_v57 = vrot.slane %v189_v41, %v1092_v13  ;;  %v429_v58 = vrot.slane %v203_v51, %v1090_v12  ;;  %p1026_p11 = por %p1025_p10, %p1024_p9 }
  0x42   :  { %v843_v23 = vcombine.low %v665_v48, %v673_v49  ;;  %v936_v59 = vadd.f32 %v840_v53, %v32_v46  ;;  %v937_v60 = vadd.f32 %v841_v54, %v33_v47  ;;  %v433_v62 = vrot.slane %v203_v51, %v1092_v13  ;;  %v37_v46 = vld [vmem:[#allocation2 + $0x58] sm:$0xff] }
  0x43   :  { %v850_v61 = vrot.slane %v842_v50, %v1102_v19  ;;  %v437_v0 = vrot.slane %v205_v52, %v1090_v12  ;;  %v441_v1 = vrot.slane %v205_v52, %v1092_v13  ;;  %v445_v2 = vrot.slane %v207_v56, %v1090_v12  ;;  %p1027_p12 = pnand %p1026_p11, %p1020_p8 }
  0x44   :  { %v857_v63 = vrot.slane %v843_v23, %v1102_v19  ;;  %952 = vst [vmem:[#allocation5 + $0x30] sm:$0xff] %v936_v59  ;;  %953 = vst [vmem:[#allocation5 + $0x38] sm:$0xff] %v937_v60  ;;  %v449_v5 = vrot.slane %v207_v56, %v1092_v13  ;;  %v674_v6 = vcombine.low %v421_v55, %v425_v57 }
  0x45   :  { %v682_v8 = vcombine.low %v429_v58, %v433_v62  ;;  %v224_v9 = vcombine.high %v216_v45, %v216_v45  ;;  %v690_v14 = vcombine.low %v437_v0, %v441_v1  ;;  %v232_v15 = vrot.slane %v216_v45, %v1081_v7  ;;  %v36_v45 = vld [vmem:[#allocation2 + $0x50] sm:$0xff] }
  0x46   :  { %v858_v10 = vcombine.low %v850_v61, %v857_v63  ;;  %v859_v11 = vcombine.high %v850_v61, %v857_v63  ;;  %v681_v16 = vrot.slane %v674_v6, %v1102_v19  ;;  %v698_v18 = vcombine.low %v445_v2, %v449_v5 }
  0x47   :  { %v689_v17 = vrot.slane %v682_v8, %v1102_v19  ;;  %v246_v20 = vrot.slane %v224_v9, %v1081_v7  ;;  %v697_v24 = vrot.slane %v690_v14, %v1102_v19  ;;  %v254_v25 = vcombine.high %v232_v15, %v232_v15  ;;  %v38_v9 = vld [vmem:[#allocation2 + $0x60] sm:$0xff] }
  0x48   :  { %v938_v21 = vadd.f32 %v858_v10, %v34_v3  ;;  %v939_v22 = vadd.f32 %v859_v11, %v35_v4  ;;  %v705_v27 = vrot.slane %v698_v18, %v1102_v19  ;;  %v453_v30 = vrot.slane %v232_v15, %v1090_v12  ;;  %v39_v10 = vld [vmem:[#allocation2 + $0x68] sm:$0xff] }
  0x49   :  { %v860_v28 = vcombine.low %v681_v16, %v689_v17  ;;  %v256_v29 = vcombine.high %v246_v20, %v246_v20  ;;  %v457_v31 = vrot.slane %v232_v15, %v1092_v13  ;;  %v461_v32 = vrot.slane %v246_v20, %v1090_v12 }
  0x4a   :  { %954 = vst [vmem:[#allocation5 + $0x40] sm:$0xff] %v938_v21  ;;  %955 = vst [vmem:[#allocation5 + $0x48] sm:$0xff] %v939_v22  ;;  %v465_v33 = vrot.slane %v246_v20, %v1092_v13  ;;  %v469_v34 = vrot.slane %v254_v25, %v1090_v12  ;;  %v861_v35 = vcombine.low %v697_v24, %v705_v27 }
  0x4b   :  { %v868_v36 = vrot.slane %v860_v28, %v1102_v19  ;;  %v473_v37 = vrot.slane %v254_v25, %v1092_v13  ;;  %v477_v38 = vrot.slane %v256_v29, %v1090_v12  ;;  %v481_v39 = vrot.slane %v256_v29, %v1092_v13  ;;  %v40_v28 = vld [vmem:[#allocation2 + $0x70] sm:$0xff]  ;;  %v41_v29 = vld [vmem:[#allocation2 + $0x78] sm:$0xff] }
  0x4c   :  { %v706_v40 = vcombine.low %v453_v30, %v457_v31  ;;  %v714_v41 = vcombine.low %v461_v32, %v465_v33  ;;  %v223_v42 = vrot.slane %v996_v26, %v1081_v7  ;;  %v875_v43 = vrot.slane %v861_v35, %v1102_v19 }
  0x4d   :  { %v722_v44 = vcombine.low %v469_v34, %v473_v37  ;;  %v730_v49 = vcombine.low %v477_v38, %v481_v39 }
  0x4e   :  { %v713_v47 = vrot.slane %v706_v40, %v1102_v19  ;;  %v721_v48 = vrot.slane %v714_v41, %v1102_v19  ;;  %v225_v51 = vcombine.high %v223_v42, %v223_v42  ;;  %v876_v52 = vcombine.low %v868_v36, %v875_v43 }
  0x4f   :  { %v877_v53 = vcombine.high %v868_v36, %v875_v43  ;;  %v729_v54 = vrot.slane %v722_v44, %v1102_v19  ;;  %v239_v50 = vrot.slane %v223_v42, %v1081_v7  ;;  %v737_v55 = vrot.slane %v730_v49, %v1102_v19 }
  0x50   :  { %v878_v23 = vcombine.low %v713_v47, %v721_v48  ;;  %v253_v56 = vrot.slane %v225_v51, %v1081_v7  ;;  %v940_v57 = vadd.f32 %v876_v52, %v36_v45 }
  0x51   :  { %v941_v58 = vadd.f32 %v877_v53, %v37_v46  ;;  %v255_v59 = vcombine.high %v239_v50, %v239_v50  ;;  %v485_v60 = vrot.slane %v239_v50, %v1090_v12  ;;  %v879_v61 = vcombine.low %v729_v54, %v737_v55 }
  0x52   :  { %v886_v62 = vrot.slane %v878_v23, %v1102_v19  ;;  %v257_v63 = vcombine.high %v253_v56, %v253_v56  ;;  %v489_v0 = vrot.slane %v239_v50, %v1092_v13  ;;  %956 = vst [vmem:[#allocation5 + $0x50] sm:$0xff] %v940_v57  ;;  %v493_v1 = vrot.slane %v253_v56, %v1090_v12 }
  0x53   :  { %957 = vst [vmem:[#allocation5 + $0x58] sm:$0xff] %v941_v58  ;;  %v497_v2 = vrot.slane %v253_v56, %v1092_v13  ;;  %v501_v3 = vrot.slane %v255_v59, %v1090_v12  ;;  %v505_v7 = vrot.slane %v255_v59, %v1092_v13  ;;  %v893_v4 = vrot.slane %v879_v61, %v1102_v19 }
  0x54   :  { %v509_v5 = vrot.slane %v257_v63, %v1090_v12  ;;  %v513_v6 = vrot.slane %v257_v63, %v1092_v13  ;;  %v738_v8 = vcombine.low %v485_v60, %v489_v0 }
  0x55   :  { %v746_v11 = vcombine.low %v493_v1, %v497_v2  ;;  %v754_v14 = vcombine.low %v501_v3, %v505_v7  ;;  %v894_v15 = vcombine.low %v886_v62, %v893_v4  ;;  %v895_v16 = vcombine.high %v886_v62, %v893_v4 }
  0x56   :  { %v745_v17 = vrot.slane %v738_v8, %v1102_v19  ;;  %v762_v18 = vcombine.low %v509_v5, %v513_v6 }
  0x57   :  { %v753_v20 = vrot.slane %v746_v11, %v1102_v19  ;;  %v761_v21 = vrot.slane %v754_v14, %v1102_v19  ;;  %v942_v22 = vadd.f32 %v894_v15, %v38_v9  ;;  %v943_v24 = vadd.f32 %v895_v16, %v39_v10 }
  0x58   :  { %v769_v12 = vrot.slane %v762_v18, %v1102_v19 }
  0x59   :  { %v896_v25 = vcombine.low %v745_v17, %v753_v20  ;;  %958 = vst [vmem:[#allocation5 + $0x60] sm:$0xff] %v942_v22  ;;  %959 = vst [vmem:[#allocation5 + $0x68] sm:$0xff] %v943_v24 }
  0x5a   :  { %v897_v13 = vcombine.low %v761_v21, %v769_v12 }
  0x5b   :  { %v904_v26 = vrot.slane %v896_v25, %v1102_v19 }
  0x5c   :  { %v911_v27 = vrot.slane %v897_v13, %v1102_v19 }
  0x5e   :  { %v912_v30 = vcombine.low %v904_v26, %v911_v27  ;;  %v913_v31 = vcombine.high %v904_v26, %v911_v27 }
  0x60   :  { %v944_v32 = vadd.f32 %v912_v30, %v40_v28  ;;  %v945_v33 = vadd.f32 %v913_v31, %v41_v29 }
  0x62   :  { %960 = vst [vmem:[#allocation5 + $0x70] sm:$0xff] %v944_v32  ;;  %961 = vst [vmem:[#allocation5 + $0x78] sm:$0xff] %v945_v33 }
  0x63   :  { %1030 = shalt.err (!%p1027_p12)
}
  0x64   :  { %s1031_s14 = scalar_lea.hbm %s1276_s2, 2048 }
  0x65   :  { %p1032_p13 = scmp.ne.s32.totalorder %s1276_s2, %s1031_s14  ;;  %p1035_p0 = scmp.lt.u32.totalorder %s1031_s14, %s1276_s2 }
  0x67   :  { %p1037_p1 = pnand %p1035_p0, %p1032_p13 }
  0x69   :  { %1040 = shalt.err (!%p1037_p1)
}
  0x6a   :  { %973 = dma.vmem_to_hbm [thread:$0]  %s968_s10, 2048, %s1276_s2, [#allocation4], %s1046_s19, %s1046_s19, %s1047_s20  }
  0x6b   :  { %1043 = dma.done.wait [#allocation4], 2048  }
  0x6c   :  { %1044 = vsyncadd [#allocation4], 4294965248 }
  0x6d   :  { %977 = vsyncpa [#allocation3], 1 }
  0x6e   :  { %978 = vsyncpa [#allocation4], 1 }

</bundles_post_ra>
